<compile_context>
chip_gen: v6e
topology: v6e:2x2x1
jax: 0.10.0
libtpu: 0.0.40
codegen_flags: <defaults>
</compile_context>

<pallas_src>
import functools

import jax
import jax.numpy as jnp
from jax.experimental import pallas as pl
from jax.experimental.pallas import tpu as pltpu


def _cls_head_kernel(cls_ref, w_ref, b_ref, out_ref):
    """cls_ref: (tb, H) bf16   — CLS-token activations (dense slab).
       w_ref  : (H, Lpad) bf16 — classifier weight, pre-transposed & lane-padded.
       b_ref  : (1, Lpad) f32  — classifier bias, lane-padded.
       out_ref: (tb, Lpad) f32 — padded logits.
    """
    # x = dropout(outputs[0][:, 0, :]) in eval mode == identity.
    acc = jnp.dot(cls_ref[...], w_ref[...], preferred_element_type=jnp.float32)
    out_ref[...] = (acc + b_ref[...]).astype(out_ref.dtype)


def custom_model_head(last_hidden_state, classifier_weight, classifier_bias,
                      *, block_b=1024):
    """Pallas implementation of:
         x = dropout(last_hidden_state[:, 0, :])   (eval mode -> identity)
         logits = x @ classifier_weight.T + classifier_bias
       Returns logits of shape (B, num_labels) in float32.
    """
    B, S, H = last_hidden_state.shape
    L = classifier_bias.shape[0]

    # --- wrapper-side glue (plain JAX, cheap / hoistable) --------------------
    # CLS slice here -> kernel gets one contiguous, dense (B, H) slab.
    cls = last_hidden_state[:, 0, :]
    cls_bf16 = cls.astype(jnp.bfloat16)

    # Pad the label dim up to a lane-dense multiple of 128.
    l_pad = max(128, pl.cdiv(L, 128) * 128)
    w_t = jnp.zeros((H, l_pad), dtype=jnp.bfloat16)
    w_t = w_t.at[:, :L].set(classifier_weight.T.astype(jnp.bfloat16))
    b2d = jnp.zeros((1, l_pad), dtype=jnp.float32)
    b2d = b2d.at[:, :L].set(classifier_bias.astype(jnp.float32))

    vmem_spec = pl.BlockSpec(memory_space=pltpu.MemorySpace.VMEM)

    if B <= block_b:
        # Small batch: grid-free call, whole operands resident in VMEM.
        # No per-step grid machinery, no double-buffering of single-use blocks.
        logits_padded = pl.pallas_call(
            _cls_head_kernel,
            out_shape=jax.ShapeDtypeStruct((B, l_pad), jnp.float32),
            in_specs=[vmem_spec, vmem_spec, vmem_spec],
            out_specs=vmem_spec,
        )(cls_bf16, w_t, b2d)
        return logits_padded[:, :L]

    # Large batch: tile the B axis so the next CLS tile DMA overlaps the
    # current matmul; weight/bias stay resident (index_map -> (0, 0)).
    tb = block_b                      # multiple of 8 (sublane) by construction
    b_pad = pl.cdiv(B, tb) * tb
    if b_pad != B:
        cls_bf16 = jnp.pad(cls_bf16, ((0, b_pad - B), (0, 0)))

    logits_padded = pl.pallas_call(
        _cls_head_kernel,
        out_shape=jax.ShapeDtypeStruct((b_pad, l_pad), jnp.float32),
        grid=(b_pad // tb,),
        in_specs=[
            pl.BlockSpec((tb, H), lambda i: (i, 0)),
            pl.BlockSpec((H, l_pad), lambda i: (0, 0)),
            pl.BlockSpec((1, l_pad), lambda i: (0, 0)),
        ],
        out_specs=pl.BlockSpec((tb, l_pad), lambda i: (i, 0)),
        compiler_params=pltpu.CompilerParams(
            # B tiles are independent -> shard across TensorCores on v7x.
            dimension_semantics=("parallel",),
        ),
    )(cls_bf16, w_t, b2d)
    return logits_padded[:B, :L]


if __name__ == "__main__":
    # Small shapes consistent with the module's forward.
    B, S, H, NUM_LABELS = 2, 8, 32, 4

    key = jax.random.PRNGKey(0)
    k_hs, k_w, k_b = jax.random.split(key, 3)

    # Synthetic backbone output (stand-in for outputs[0] of the AutoModel).
    last_hidden_state = jax.random.normal(k_hs, (B, S, H), dtype=jnp.float32)

    # nn.Linear(hidden_size, num_labels): weight (num_labels, hidden_size), bias (num_labels,)
    classifier_weight = (
        jax.random.normal(k_w, (NUM_LABELS, H), dtype=jnp.float32) * 0.02
    )
    classifier_bias = jax.random.normal(k_b, (NUM_LABELS,), dtype=jnp.float32) * 0.02

    logits = custom_model_head(last_hidden_state, classifier_weight, classifier_bias)
    logits = jax.block_until_ready(logits)
    assert logits.shape == (B, NUM_LABELS)

    # Reference with the same bf16-operand / f32-accumulate semantics.
    cls_ref = last_hidden_state[:, 0, :].astype(jnp.bfloat16)
    w_ref = classifier_weight.T.astype(jnp.bfloat16)
    ref_bf16 = (
        jnp.dot(cls_ref, w_ref, preferred_element_type=jnp.float32)
        + classifier_bias
    )
    assert jnp.allclose(logits, ref_bf16, atol=1e-3, rtol=1e-3)

    # Full-precision reference (torch eval-mode semantics) within bf16 tolerance.
    ref_f32 = last_hidden_state[:, 0, :] @ classifier_weight.T + classifier_bias
    assert jnp.allclose(logits, ref_f32, atol=5e-2, rtol=5e-2)

    print("KERNEL_OK")
</pallas_src>

<mosaic_0001>
module attributes {stable_mosaic.version = 11 : i64} {
  func.func @_cls_head_kernel(%arg0: memref<2x32xbf16, #tpu.memory_space<vmem>>, %arg1: memref<32x128xbf16, #tpu.memory_space<vmem>>, %arg2: memref<1x128xf32, #tpu.memory_space<vmem>>, %arg3: memref<2x128xf32, #tpu.memory_space<vmem>>) attributes {dimension_semantics = [], scalar_prefetch = 0 : i64, scratch_operands = 0 : i64, tpu.core_type = #tpu.core_type<tc>} {
    %c0 = arith.constant 0 : index
    %c0_0 = arith.constant 0 : index
    %0 = vector.load %arg0[%c0, %c0_0] : memref<2x32xbf16, #tpu.memory_space<vmem>>, vector<2x32xbf16>
    %c0_1 = arith.constant 0 : index
    %c0_2 = arith.constant 0 : index
    %1 = vector.load %arg1[%c0_1, %c0_2] : memref<32x128xbf16, #tpu.memory_space<vmem>>, vector<32x128xbf16>
    %cst = arith.constant dense<0.000000e+00> : vector<2x128xf32>
    %2 = tpu.matmul %0, %1, %cst {dimension_numbers = #tpu.dot_dimension_numbers<[1], [0], [0], [1], [0, 0, 1, 1], [], []>} : vector<2x32xbf16>, vector<32x128xbf16>, vector<2x128xf32> -> vector<2x128xf32>
    %c0_3 = arith.constant 0 : index
    %c0_4 = arith.constant 0 : index
    %3 = vector.load %arg2[%c0_3, %c0_4] : memref<1x128xf32, #tpu.memory_space<vmem>>, vector<1x128xf32>
    %4 = vector.broadcast %3 : vector<1x128xf32> to vector<2x128xf32>
    %5 = arith.addf %2, %4 : vector<2x128xf32>
    %c0_5 = arith.constant 0 : index
    %c0_6 = arith.constant 0 : index
    %6 = vector.load %arg3[%c0_5, %c0_6] : memref<2x128xf32, #tpu.memory_space<vmem>>, vector<2x128xf32>
    tpu.vector_store %arg3[%c0_5, %c0_6], %5 {strides = array<i32>} : memref<2x128xf32, #tpu.memory_space<vmem>>, vector<2x128xf32>,
    return
  }
}

</mosaic_0001>

<bundles_post_ra>
// kernel: tpu_custom_call.1
= control target key start
LH: loop header
LB: loop body
LE: loop exit
PB: predicated region body
PF: predicated region fallthrough
CT: control target
= control target key end

     0   :  { %8 = vsyncpa [#allocation3], 0  ;;  %s256_s0 = inlined_call_operand.hbm [shape: bf16[2,32], index: 0, kind: input, shape index: {}]   ;;  %s257_s1 = inlined_call_operand.hbm [shape: bf16[32,128], index: 1, kind: input, shape index: {}]   ;;  %s258_s2 = inlined_call_operand.vmem [shape: f32[1,128], index: 2, kind: input, shape index: {}]   ;;  %s259_s3 = inlined_call_operand.hbm [shape: f32[2,128], index: 3, kind: output, shape index: {}]  }
   0x1   :  { %9 = vsyncpa [#allocation6], 0 }
   0x2   :  { %10 = vsyncpa [#allocation4], 0  ;;  %s217_s12 = smov [#allocation2]   ;;  %s218_s14 = smov [#allocation5]  }
   0x3   :  { %s17_s13 = sshll.u32 %s217_s12, 4  ;;  %s26_s15 = sshll.u32 %s218_s14, 4  ;;  %s18_s13 = int_to_ptr.vmem [resolvable:$true] %s17_s13  ;;  %s27_s15 = int_to_ptr.vmem [resolvable:$true] %s26_s15 }
   0x4   :  { %s159_s16 = scalar_lea.vmem %s18_s13, 16  ;;  %s163_s17 = scalar_lea.vmem %s18_s13, 32 }
   0x5   :  { %p160_p0 = scmp.ne.s32.totalorder %s18_s13, %s159_s16  ;;  %p164_p1 = scmp.lt.s32.totalorder %s18_s13, %s18_s13 }
   0x6   :  { %p165_p2 = scmp.lt.s32.totalorder %s163_s17, %s159_s16 }
   0x8   :  { %p166_p3 = por %p165_p2, %p164_p1 }
   0xa   :  { %p167_p4 = pnand %p166_p3, %p160_p0 }
   0xc   :  { %170 = shalt.err (!%p167_p4)
}
   0xd   :  { %20 = dma.hbm_to_vmem [thread:$0]  %s256_s0, 16, %s18_s13, [#allocation3]  }
   0xe   :  { %s179_s20 = scalar_lea.vmem %s27_s15, 256  ;;  %p184_p6 = scmp.lt.s32.totalorder %s27_s15, %s27_s15 }
   0xf   :  { %p180_p5 = scmp.ne.s32.totalorder %s27_s15, %s179_s20  ;;  %p185_p7 = scmp.lt.s32.totalorder %s179_s20, %s179_s20 }
  0x11   :  { %p186_p8 = por %p185_p7, %p184_p6 }
  0x13   :  { %p187_p9 = pnand %p186_p8, %p180_p5 }
  0x15   :  { %190 = shalt.err (!%p187_p9)
}
  0x16   :  { %s219_s21 = smov 64   ;;  %s220_s22 = smov 4  }
  0x17   :  { %32 = dma.hbm_to_vmem [thread:$0]  %s257_s1, 256, %s27_s15, [#allocation6], %s219_s21, %s219_s21, %s220_s22  }
  0x18   :  { %211 = dma.done.wait [#allocation3], 16  }
  0x19   :  { %212 = vsyncadd [#allocation3], 4294967280 }
  0x1a   :  { %213 = dma.done.wait [#allocation6], 256  }
  0x1b   :  { %214 = vsyncadd [#allocation6], 4294967040  ;;  %v221_v0 = vmov 0.0   ;;  %vm222_vm0 = vmmov 0   ;;  %v149_v1 = vld [vmem:[#allocation5 + $0x8] sm:$0xff]   ;;  %v150_v2 = vld [vmem:[#allocation5] sm:$0xff]  }
  0x1c   :  { %134 = vmatprep.subr.bf16.mxu0 %v221_v0  ;;  %138 = vmatprep.mubr.msk.bf16.mxu0 %vm222_vm0, %v221_v0  ;;  %v42_v3 = vld [vmem:[#allocation2] sm:$0x1]  ;;  %vm66_vm1 = vcmask 261120   ;;  %s223_s1 = smov [#allocation7]  }
  0x1d   :  { %135 = vmatpush3.bf16.msra.mxu0 %v149_v1  ;;  %v127_v4 = vld [vmem:[%s258_s2] ss:$0 sm:$0xff]  ;;  %s117_s26 = sshll.u32 %s223_s1, 4  ;;  %s118_s26 = int_to_ptr.vmem [resolvable:$true] %s117_s26 }
  0x1e   :  { %136 = vmatprep.subr.bf16.mxu0 %v221_v0  ;;  %s191_s27 = scalar_lea.vmem %s118_s26, 32  ;;  %p196_p11 = scmp.lt.s32.totalorder %s118_s26, %s118_s26 }
  0x1f   :  { %p192_p10 = scmp.ne.s32.totalorder %s118_s26, %s191_s27  ;;  %p197_p12 = scmp.lt.s32.totalorder %s191_s27, %s191_s27 }
  0x21   :  { %137 = vmatpush3.bf16.msra.mxu0 %v150_v2  ;;  %p198_p13 = por %p197_p12, %p196_p11 }
  0x23   :  { %p199_p0 = pnand %p198_p13, %p192_p10 }
  0x24   :  { %139 = vmatmul.mubr.msk.bf16.vlgmr.msra.gmra.mxu0 %vm66_vm1, %v42_v3 }
  0xe4   :  { %v104_v5 = vpop.f32.mrf.mxu0 }
  0xe5   :  { %v105_v6 = vadd.f32 %v127_v4, %v104_v5 }
  0xe6   :  { %v140_v7 = vpop.f32.mrf.mxu0 }
  0xe7   :  { %110 = vst [vmem:[#allocation7] sm:$0x3] %v105_v6 }
  0xe8   :  { %v107_v8 = vpop.f32.mrf.mxu0 }
  0xe9   :  { %202 = shalt.err (!%p199_p0)
}
  0xea   :  { %120 = dma.vmem_to_hbm [thread:$0]  %s118_s26, 32, %s259_s3, [#allocation4]   ;;  %v141_v9 = vpop.f32.mrf.mxu0 }
  0xeb   :  { %215 = dma.done.wait [#allocation4], 32  }
  0xec   :  { %216 = vsyncadd [#allocation4], 4294967264 }
  0xed   :  { %124 = vsyncpa [#allocation3], 1 }
  0xee   :  { %125 = vsyncpa [#allocation6], 1 }
  0xef   :  { %126 = vsyncpa [#allocation4], 1 }

</bundles_post_ra>
